<compile_context>
chip_gen: v7x
topology: tpu7x:2x2x1
jax: 0.10.0
libtpu: 0.0.40
codegen_flags: <defaults>
</compile_context>

<pallas_src>
import functools

import jax
import jax.numpy as jnp
from jax.experimental import pallas as pl
from jax.experimental.pallas import tpu as pltpu

HIDDEN = 150   # fixed by the module definition
_LANE = 128


def _round_up(x, m):
    return (x + m - 1) // m * m


def _cdiv(a, b):
    return (a + b - 1) // b


# ----------------------------------------------------------------------------
# Pallas kernel: one batch tile of the full forward pass (6 matmuls + ReLUs +
# reparameterization).  All weight refs are whole padded bf16 arrays, resident
# in VMEM across the grid; activations are (TB, padded_width) f32 tiles.
# ----------------------------------------------------------------------------
def vae_forward_kernel(
    xe_ref,                                                   # [x | eps] streaming tile
    w1_ref, b1_ref, w2_ref, b2_ref,                           # encoder trunk
    wh_ref, bh_ref,                                           # fused mu|logvar head
    wd1_ref, bd1_ref, wd2_ref, bd2_ref, wd3_ref, bd3_ref,     # decoder
    out_ref, head_ref,                                        # outputs: dec out, [mu|logvar]
):
    f32 = jnp.float32
    bf16 = jnp.bfloat16

    DP = out_ref.shape[1]               # padded input/output width (multiple of 128)
    CP = head_ref.shape[1] // 2         # padded code width (multiple of 128)

    xe = xe_ref[...]
    x = xe[:, :DP]                       # slice at 128-lane boundaries: layout-aligned
    eps = xe[:, DP:DP + CP]              # f32

    # --- encoder: Linear -> ReLU -> Linear -> ReLU (bf16 MXU, f32 accum/VPU) ---
    h = jnp.dot(x.astype(bf16), w1_ref[...], preferred_element_type=f32) + b1_ref[...]
    h = jnp.maximum(h, 0.0)
    h = jnp.dot(h.astype(bf16), w2_ref[...], preferred_element_type=f32) + b2_ref[...]
    h = jnp.maximum(h, 0.0)

    # --- fused heads: one matmul produces [mu | logvar], each CP lanes wide ---
    y = jnp.dot(h.astype(bf16), wh_ref[...], preferred_element_type=f32) + bh_ref[...]
    mu = y[:, :CP]
    logvar = y[:, CP:]
    stds = jnp.exp(0.5 * logvar)          # padded lanes: exp(0) = 1 (harmless)

    # --- reparameterization (padded eps lanes are zero -> padded code lanes 0) ---
    code = eps * stds + mu

    # --- decoder: Linear -> ReLU -> Linear -> ReLU -> Linear ---
    d = jnp.dot(code.astype(bf16), wd1_ref[...], preferred_element_type=f32) + bd1_ref[...]
    d = jnp.maximum(d, 0.0)
    d = jnp.dot(d.astype(bf16), wd2_ref[...], preferred_element_type=f32) + bd2_ref[...]
    d = jnp.maximum(d, 0.0)
    out = jnp.dot(d.astype(bf16), wd3_ref[...], preferred_element_type=f32) + bd3_ref[...]

    # lane-dense (>=128-wide) stores; mu|logvar written as one fused block
    out_ref[...] = out
    head_ref[...] = y


# ----------------------------------------------------------------------------
# Wrapper
# ----------------------------------------------------------------------------
def _resident_spec(shape):
    # Whole (padded) array as one block; constant block index across the grid
    # so Pallas keeps it VMEM-resident (DMA once, no per-step refetch).
    return pl.BlockSpec(shape, lambda i: (0,) * len(shape))


def _act_spec(tb, width):
    return pl.BlockSpec((tb, width), lambda i: (i, 0))


@functools.partial(jax.jit, static_argnames=("tb",))
def vae_forward(obs_z, epsilon, kparams, *, tb=1024):
    """obs_z: (B, obs_dim+z_dim), epsilon: (B, code_dim); kparams from pack_params."""
    B, D = obs_z.shape
    code_dim = epsilon.shape[1]

    DP = kparams["w1"].shape[0]      # padded input / output width
    CP = kparams["wd1"].shape[0]     # padded code width

    # --- batch tiling: >=2 grid steps when possible (v7x 2-TC), tight last tile ---
    Bp8 = _round_up(B, 8)
    tb_eff = min(tb, max(8, _round_up(_cdiv(Bp8, 2), 8)))   # cap -> >=2 steps if B>8
    nt = max(1, _cdiv(Bp8, tb_eff))                         # number of grid steps
    TB = _round_up(_cdiv(Bp8, nt), 8)                       # re-fit tile to batch
    Bp = nt * TB                                            # <=7 garbage rows total

    # Single concatenated streaming input: [ x (DP lanes) | eps (CP lanes) ].
    xe_pad = jnp.zeros((Bp, DP + CP), jnp.float32)
    xe_pad = xe_pad.at[:B, :D].set(obs_z.astype(jnp.float32))
    xe_pad = xe_pad.at[:B, DP:DP + code_dim].set(epsilon.astype(jnp.float32))

    args = (
        xe_pad,
        kparams["w1"], kparams["b1"], kparams["w2"], kparams["b2"],
        kparams["wh"], kparams["bh"],
        kparams["wd1"], kparams["bd1"], kparams["wd2"], kparams["bd2"],
        kparams["wd3"], kparams["bd3"],
    )

    grid = (nt,)
    in_specs = [_act_spec(TB, DP + CP)] + \
               [_resident_spec(a.shape) for a in args[1:]]

    out_shapes = (
        jax.ShapeDtypeStruct((Bp, DP), jnp.float32),       # padded decoder output
        jax.ShapeDtypeStruct((Bp, 2 * CP), jnp.float32),   # padded [mu | logvar]
    )
    out_specs = (_act_spec(TB, DP), _act_spec(TB, 2 * CP))

    out_p, head_p = pl.pallas_call(
        vae_forward_kernel,
        out_shape=out_shapes,
        grid=grid,
        in_specs=in_specs,
        out_specs=out_specs,
        compiler_params=pltpu.CompilerParams(
            dimension_semantics=("parallel",),   # independent batch tiles (v7x 2-TC)
        ),
    )(*args)

    obs_distr_params = out_p[:B, :D]
    mu = head_p[:B, :code_dim]
    logvar = head_p[:B, CP:CP + code_dim]
    stds = jnp.exp(0.5 * logvar)                 # recomputed on tiny sliced tensor
    return obs_distr_params, (mu, logvar, stds)


# ----------------------------------------------------------------------------
# Parameter construction (mirrors weight_init: orthogonal weights, zero biases).
# Weights stored transposed (in, out) so the kernel computes y = x @ W + b.
# ----------------------------------------------------------------------------
def _orthogonal(key, out_dim, in_dim):
    a = jax.random.normal(key, (max(out_dim, in_dim), min(out_dim, in_dim)),
                          dtype=jnp.float32)
    q, r = jnp.linalg.qr(a)
    q = q * jnp.sign(jnp.diagonal(r))[None, :]
    if out_dim < in_dim:
        q = q.T
    return q[:out_dim, :in_dim].astype(jnp.float32)


def make_params(key, obs_dim, z_dim, code_dim):
    D = obs_dim + z_dim
    ks = jax.random.split(key, 7)

    def linear(k, in_dim, out_dim):
        w = _orthogonal(k, out_dim, in_dim)                  # PyTorch layout (out, in)
        return w.T, jnp.zeros((1, out_dim), jnp.float32)     # kernel layout (in, out)

    w1, b1 = linear(ks[0], D, HIDDEN)
    w2, b2 = linear(ks[1], HIDDEN, HIDDEN)
    wmu, bmu = linear(ks[2], HIDDEN, code_dim)
    wlv, blv = linear(ks[3], HIDDEN, code_dim)
    wd1, bd1 = linear(ks[4], code_dim, HIDDEN)
    wd2, bd2 = linear(ks[5], HIDDEN, HIDDEN)
    wd3, bd3 = linear(ks[6], HIDDEN, D)

    return dict(w1=w1, b1=b1, w2=w2, b2=b2, wmu=wmu, bmu=bmu, wlv=wlv, blv=blv,
                wd1=wd1, bd1=bd1, wd2=wd2, bd2=bd2, wd3=wd3, bd3=bd3)


def pack_params(p):
    """Zero-pad every dim to a multiple of 128, fuse the mu/logvar heads, and
    cast weights to bf16 (MXU operands).  Biases stay f32 (added to the f32
    accumulator on the VPU).

    Padding is exact: padded weight rows/cols and biases are zero, so padded
    lanes of every intermediate are 0 (or 1 after exp) and never contaminate
    the real lanes.
    """
    D, H = p["w1"].shape
    C = p["wmu"].shape[1]
    DP, HP, CP = _round_up(D, _LANE), _round_up(H, _LANE), _round_up(C, _LANE)

    def pad_w(w, r, c):
        return jnp.pad(w, ((0, r - w.shape[0]), (0, c - w.shape[1]))).astype(jnp.bfloat16)

    def pad_b(b, c):
        return jnp.pad(b, ((0, 0), (0, c - b.shape[1]))).astype(jnp.float32)

    wh = jnp.concatenate([pad_w(p["wmu"], HP, CP), pad_w(p["wlv"], HP, CP)], axis=1)
    bh = jnp.concatenate([pad_b(p["bmu"], CP), pad_b(p["blv"], CP)], axis=1)

    return dict(
        w1=pad_w(p["w1"], DP, HP), b1=pad_b(p["b1"], HP),
        w2=pad_w(p["w2"], HP, HP), b2=pad_b(p["b2"], HP),
        wh=wh, bh=bh,
        wd1=pad_w(p["wd1"], CP, HP), bd1=pad_b(p["bd1"], HP),
        wd2=pad_w(p["wd2"], HP, HP), bd2=pad_b(p["bd2"], HP),
        wd3=pad_w(p["wd3"], HP, DP), bd3=pad_b(p["bd3"], DP),
    )


# Pure-JAX f32 reference of the same forward pass (unpadded), for sanity checking.
def vae_forward_ref(obs_z, epsilon, p):
    h = jnp.maximum(obs_z @ p["w1"] + p["b1"], 0.0)
    h = jnp.maximum(h @ p["w2"] + p["b2"], 0.0)
    mu = h @ p["wmu"] + p["bmu"]
    logvar = h @ p["wlv"] + p["blv"]
    stds = jnp.exp(0.5 * logvar)
    code = epsilon * stds + mu
    d = jnp.maximum(code @ p["wd1"] + p["bd1"], 0.0)
    d = jnp.maximum(d @ p["wd2"] + p["bd2"], 0.0)
    out = d @ p["wd3"] + p["bd3"]
    return out, (mu, logvar, stds)


if __name__ == "__main__":
    # Small shapes consistent with the module: obs_dim=20, z_dim=12, code_dim=16.
    obs_dim, z_dim, code_dim, batch = 20, 12, 16, 8
    D = obs_dim + z_dim

    root = jax.random.PRNGKey(0)
    k_params, k_obs, k_z, k_eps = jax.random.split(root, 4)

    params = make_params(k_params, obs_dim, z_dim, code_dim)
    kparams = pack_params(params)

    obs = jax.random.normal(k_obs, (batch, obs_dim), dtype=jnp.float32)
    z = jax.random.normal(k_z, (batch, z_dim), dtype=jnp.float32)
    obs_z = jnp.concatenate([obs, z], axis=1)                  # (B, obs_dim + z_dim)
    epsilon = jax.random.normal(k_eps, (batch, code_dim), dtype=jnp.float32)

    out, (mu, logvar, stds) = vae_forward(obs_z, epsilon, kparams)
    jax.block_until_ready((out, mu, logvar, stds))

    # Sanity check against the pure-JAX f32 reference (bf16 matmul operands ->
    # relaxed tolerances).
    out_r, (mu_r, logvar_r, stds_r) = vae_forward_ref(obs_z, epsilon, params)
    assert out.shape == (batch, D) and mu.shape == (batch, code_dim)
    assert jnp.allclose(out, out_r, atol=8e-2, rtol=8e-2)
    assert jnp.allclose(mu, mu_r, atol=8e-2, rtol=8e-2)
    assert jnp.allclose(logvar, logvar_r, atol=8e-2, rtol=8e-2)
    assert jnp.allclose(stds, stds_r, atol=8e-2, rtol=8e-2)

    print("KERNEL_OK")
</pallas_src>

<mosaic_0001>
module attributes {stable_mosaic.version = 11 : i64} {
  func.func @vae_forward_kernel(%arg0: i32, %arg1: memref<8x256xf32, #tpu.memory_space<vmem>>, %arg2: memref<128x256xbf16, #tpu.memory_space<vmem>>, %arg3: memref<1x256xf32, #tpu.memory_space<vmem>>, %arg4: memref<256x256xbf16, #tpu.memory_space<vmem>>, %arg5: memref<1x256xf32, #tpu.memory_space<vmem>>, %arg6: memref<256x256xbf16, #tpu.memory_space<vmem>>, %arg7: memref<1x256xf32, #tpu.memory_space<vmem>>, %arg8: memref<128x256xbf16, #tpu.memory_space<vmem>>, %arg9: memref<1x256xf32, #tpu.memory_space<vmem>>, %arg10: memref<256x256xbf16, #tpu.memory_space<vmem>>, %arg11: memref<1x256xf32, #tpu.memory_space<vmem>>, %arg12: memref<256x128xbf16, #tpu.memory_space<vmem>>, %arg13: memref<1x128xf32, #tpu.memory_space<vmem>>, %arg14: memref<8x128xf32, #tpu.memory_space<vmem>>, %arg15: memref<8x256xf32, #tpu.memory_space<vmem>>) attributes {dimension_semantics = [#tpu.dimension_semantics<parallel>], iteration_bounds = array<i64: 1>, scalar_prefetch = 0 : i64, scratch_operands = 0 : i64, tpu.core_type = #tpu.core_type<tc>, window_params = [{transform_indices = @transform_0, window_bounds = array<i64: 8, 256>}, {pipeline_mode = #tpu.pipeline_mode<synchronous>, transform_indices = @transform_1, window_bounds = array<i64: 128, 256>}, {pipeline_mode = #tpu.pipeline_mode<synchronous>, transform_indices = @transform_2, window_bounds = array<i64: 1, 256>}, {pipeline_mode = #tpu.pipeline_mode<synchronous>, transform_indices = @transform_3, window_bounds = array<i64: 256, 256>}, {pipeline_mode = #tpu.pipeline_mode<synchronous>, transform_indices = @transform_4, window_bounds = array<i64: 1, 256>}, {pipeline_mode = #tpu.pipeline_mode<synchronous>, transform_indices = @transform_5, window_bounds = array<i64: 256, 256>}, {pipeline_mode = #tpu.pipeline_mode<synchronous>, transform_indices = @transform_6, window_bounds = array<i64: 1, 256>}, {pipeline_mode = #tpu.pipeline_mode<synchronous>, transform_indices = @transform_7, window_bounds = array<i64: 128, 256>}, {pipeline_mode = #tpu.pipeline_mode<synchronous>, transform_indices = @transform_8, window_bounds = array<i64: 1, 256>}, {pipeline_mode = #tpu.pipeline_mode<synchronous>, transform_indices = @transform_9, window_bounds = array<i64: 256, 256>}, {pipeline_mode = #tpu.pipeline_mode<synchronous>, transform_indices = @transform_10, window_bounds = array<i64: 1, 256>}, {pipeline_mode = #tpu.pipeline_mode<synchronous>, transform_indices = @transform_11, window_bounds = array<i64: 256, 128>}, {pipeline_mode = #tpu.pipeline_mode<synchronous>, transform_indices = @transform_12, window_bounds = array<i64: 1, 128>}, {transform_indices = @transform_13, window_bounds = array<i64: 8, 128>}, {transform_indices = @transform_14, window_bounds = array<i64: 8, 256>}]} {
    %c0 = arith.constant 0 : index
    %c0_0 = arith.constant 0 : index
    %0 = vector.load %arg1[%c0, %c0_0] : memref<8x256xf32, #tpu.memory_space<vmem>>, vector<8x256xf32>
    %1 = vector.extract_strided_slice %0 {offsets = [0, 0], sizes = [8, 128], strides = [1, 1]} : vector<8x256xf32> to vector<8x128xf32>
    %2 = vector.extract_strided_slice %0 {offsets = [0, 128], sizes = [8, 128], strides = [1, 1]} : vector<8x256xf32> to vector<8x128xf32>
    %3 = arith.truncf %1 : vector<8x128xf32> to vector<8x128xbf16>
    %c0_1 = arith.constant 0 : index
    %c0_2 = arith.constant 0 : index
    %4 = vector.load %arg2[%c0_1, %c0_2] : memref<128x256xbf16, #tpu.memory_space<vmem>>, vector<128x256xbf16>
    %cst = arith.constant dense<0.000000e+00> : vector<8x256xf32>
    %5 = tpu.matmul %3, %4, %cst {dimension_numbers = #tpu.dot_dimension_numbers<[1], [0], [0], [1], [0, 0, 1, 1], [], []>} : vector<8x128xbf16>, vector<128x256xbf16>, vector<8x256xf32> -> vector<8x256xf32>
    %c0_3 = arith.constant 0 : index
    %c0_4 = arith.constant 0 : index
    %6 = vector.load %arg3[%c0_3, %c0_4] : memref<1x256xf32, #tpu.memory_space<vmem>>, vector<1x256xf32>
    %7 = vector.broadcast %6 : vector<1x256xf32> to vector<8x256xf32>
    %8 = arith.addf %5, %7 : vector<8x256xf32>
    %cst_5 = arith.constant 0.000000e+00 : f32
    %9 = vector.broadcast %cst_5 : f32 to vector<8x256xf32>
    %10 = arith.maximumf %8, %9 : vector<8x256xf32>
    %11 = arith.truncf %10 : vector<8x256xf32> to vector<8x256xbf16>
    %c0_6 = arith.constant 0 : index
    %c0_7 = arith.constant 0 : index
    %12 = vector.load %arg4[%c0_6, %c0_7] : memref<256x256xbf16, #tpu.memory_space<vmem>>, vector<256x256xbf16>
    %cst_8 = arith.constant dense<0.000000e+00> : vector<8x256xf32>
    %13 = tpu.matmul %11, %12, %cst_8 {dimension_numbers = #tpu.dot_dimension_numbers<[1], [0], [0], [1], [0, 0, 1, 1], [], []>} : vector<8x256xbf16>, vector<256x256xbf16>, vector<8x256xf32> -> vector<8x256xf32>
    %c0_9 = arith.constant 0 : index
    %c0_10 = arith.constant 0 : index
    %14 = vector.load %arg5[%c0_9, %c0_10] : memref<1x256xf32, #tpu.memory_space<vmem>>, vector<1x256xf32>
    %15 = vector.broadcast %14 : vector<1x256xf32> to vector<8x256xf32>
    %16 = arith.addf %13, %15 : vector<8x256xf32>
    %cst_11 = arith.constant 0.000000e+00 : f32
    %17 = vector.broadcast %cst_11 : f32 to vector<8x256xf32>
    %18 = arith.maximumf %16, %17 : vector<8x256xf32>
    %19 = arith.truncf %18 : vector<8x256xf32> to vector<8x256xbf16>
    %c0_12 = arith.constant 0 : index
    %c0_13 = arith.constant 0 : index
    %20 = vector.load %arg6[%c0_12, %c0_13] : memref<256x256xbf16, #tpu.memory_space<vmem>>, vector<256x256xbf16>
    %cst_14 = arith.constant dense<0.000000e+00> : vector<8x256xf32>
    %21 = tpu.matmul %19, %20, %cst_14 {dimension_numbers = #tpu.dot_dimension_numbers<[1], [0], [0], [1], [0, 0, 1, 1], [], []>} : vector<8x256xbf16>, vector<256x256xbf16>, vector<8x256xf32> -> vector<8x256xf32>
    %c0_15 = arith.constant 0 : index
    %c0_16 = arith.constant 0 : index
    %22 = vector.load %arg7[%c0_15, %c0_16] : memref<1x256xf32, #tpu.memory_space<vmem>>, vector<1x256xf32>
    %23 = vector.broadcast %22 : vector<1x256xf32> to vector<8x256xf32>
    %24 = arith.addf %21, %23 : vector<8x256xf32>
    %25 = vector.extract_strided_slice %24 {offsets = [0, 0], sizes = [8, 128], strides = [1, 1]} : vector<8x256xf32> to vector<8x128xf32>
    %26 = vector.extract_strided_slice %24 {offsets = [0, 128], sizes = [8, 128], strides = [1, 1]} : vector<8x256xf32> to vector<8x128xf32>
    %cst_17 = arith.constant 5.000000e-01 : f32
    %27 = vector.broadcast %cst_17 : f32 to vector<8x128xf32>
    %28 = arith.mulf %27, %26 : vector<8x128xf32>
    %29 = math.exp %28 : vector<8x128xf32>
    %30 = arith.mulf %2, %29 : vector<8x128xf32>
    %31 = arith.addf %30, %25 : vector<8x128xf32>
    %32 = arith.truncf %31 : vector<8x128xf32> to vector<8x128xbf16>
    %c0_18 = arith.constant 0 : index
    %c0_19 = arith.constant 0 : index
    %33 = vector.load %arg8[%c0_18, %c0_19] : memref<128x256xbf16, #tpu.memory_space<vmem>>, vector<128x256xbf16>
    %cst_20 = arith.constant dense<0.000000e+00> : vector<8x256xf32>
    %34 = tpu.matmul %32, %33, %cst_20 {dimension_numbers = #tpu.dot_dimension_numbers<[1], [0], [0], [1], [0, 0, 1, 1], [], []>} : vector<8x128xbf16>, vector<128x256xbf16>, vector<8x256xf32> -> vector<8x256xf32>
    %c0_21 = arith.constant 0 : index
    %c0_22 = arith.constant 0 : index
    %35 = vector.load %arg9[%c0_21, %c0_22] : memref<1x256xf32, #tpu.memory_space<vmem>>, vector<1x256xf32>
    %36 = vector.broadcast %35 : vector<1x256xf32> to vector<8x256xf32>
    %37 = arith.addf %34, %36 : vector<8x256xf32>
    %cst_23 = arith.constant 0.000000e+00 : f32
    %38 = vector.broadcast %cst_23 : f32 to vector<8x256xf32>
    %39 = arith.maximumf %37, %38 : vector<8x256xf32>
    %40 = arith.truncf %39 : vector<8x256xf32> to vector<8x256xbf16>
    %c0_24 = arith.constant 0 : index
    %c0_25 = arith.constant 0 : index
    %41 = vector.load %arg10[%c0_24, %c0_25] : memref<256x256xbf16, #tpu.memory_space<vmem>>, vector<256x256xbf16>
    %cst_26 = arith.constant dense<0.000000e+00> : vector<8x256xf32>
    %42 = tpu.matmul %40, %41, %cst_26 {dimension_numbers = #tpu.dot_dimension_numbers<[1], [0], [0], [1], [0, 0, 1, 1], [], []>} : vector<8x256xbf16>, vector<256x256xbf16>, vector<8x256xf32> -> vector<8x256xf32>
    %c0_27 = arith.constant 0 : index
    %c0_28 = arith.constant 0 : index
    %43 = vector.load %arg11[%c0_27, %c0_28] : memref<1x256xf32, #tpu.memory_space<vmem>>, vector<1x256xf32>
    %44 = vector.broadcast %43 : vector<1x256xf32> to vector<8x256xf32>
    %45 = arith.addf %42, %44 : vector<8x256xf32>
    %cst_29 = arith.constant 0.000000e+00 : f32
    %46 = vector.broadcast %cst_29 : f32 to vector<8x256xf32>
    %47 = arith.maximumf %45, %46 : vector<8x256xf32>
    %48 = arith.truncf %47 : vector<8x256xf32> to vector<8x256xbf16>
    %c0_30 = arith.constant 0 : index
    %c0_31 = arith.constant 0 : index
    %49 = vector.load %arg12[%c0_30, %c0_31] : memref<256x128xbf16, #tpu.memory_space<vmem>>, vector<256x128xbf16>
    %cst_32 = arith.constant dense<0.000000e+00> : vector<8x128xf32>
    %50 = tpu.matmul %48, %49, %cst_32 {dimension_numbers = #tpu.dot_dimension_numbers<[1], [0], [0], [1], [0, 0, 1, 1], [], []>} : vector<8x256xbf16>, vector<256x128xbf16>, vector<8x128xf32> -> vector<8x128xf32>
    %c0_33 = arith.constant 0 : index
    %c0_34 = arith.constant 0 : index
    %51 = vector.load %arg13[%c0_33, %c0_34] : memref<1x128xf32, #tpu.memory_space<vmem>>, vector<1x128xf32>
    %52 = vector.broadcast %51 : vector<1x128xf32> to vector<8x128xf32>
    %53 = arith.addf %50, %52 : vector<8x128xf32>
    %c0_35 = arith.constant 0 : index
    %c0_36 = arith.constant 0 : index
    %54 = vector.load %arg14[%c0_35, %c0_36] : memref<8x128xf32, #tpu.memory_space<vmem>>, vector<8x128xf32>
    tpu.vector_store %arg14[%c0_35, %c0_36], %53 {strides = array<i32>} : memref<8x128xf32, #tpu.memory_space<vmem>>, vector<8x128xf32>,
    %c0_37 = arith.constant 0 : index
    %c0_38 = arith.constant 0 : index
    %55 = vector.load %arg15[%c0_37, %c0_38] : memref<8x256xf32, #tpu.memory_space<vmem>>, vector<8x256xf32>
    tpu.vector_store %arg15[%c0_37, %c0_38], %24 {strides = array<i32>} : memref<8x256xf32, #tpu.memory_space<vmem>>, vector<8x256xf32>,
    return
  }
  func.func @transform_0(%arg0: i32) -> (i32, i32) {
    %c0_i32 = arith.constant 0 : i32
    %c0_i32_0 = arith.constant 0 : i32
    return %arg0, %c0_i32 : i32, i32
  }
  func.func @transform_1(%arg0: i32) -> (i32, i32) {
    %c0_i32 = arith.constant 0 : i32
    %c0_i32_0 = arith.constant 0 : i32
    %c0_i32_1 = arith.constant 0 : i32
    return %c0_i32, %c0_i32_0 : i32, i32
  }
  func.func @transform_2(%arg0: i32) -> (i32, i32) {
    %c0_i32 = arith.constant 0 : i32
    %c0_i32_0 = arith.constant 0 : i32
    %c0_i32_1 = arith.constant 0 : i32
    return %c0_i32, %c0_i32_0 : i32, i32
  }
  func.func @transform_3(%arg0: i32) -> (i32, i32) {
    %c0_i32 = arith.constant 0 : i32
    %c0_i32_0 = arith.constant 0 : i32
    %c0_i32_1 = arith.constant 0 : i32
    return %c0_i32, %c0_i32_0 : i32, i32
  }
  func.func @transform_4(%arg0: i32) -> (i32, i32) {
    %c0_i32 = arith.constant 0 : i32
    %c0_i32_0 = arith.constant 0 : i32
    %c0_i32_1 = arith.constant 0 : i32
    return %c0_i32, %c0_i32_0 : i32, i32
  }
  func.func @transform_5(%arg0: i32) -> (i32, i32) {
    %c0_i32 = arith.constant 0 : i32
    %c0_i32_0 = arith.constant 0 : i32
    %c0_i32_1 = arith.constant 0 : i32
    return %c0_i32, %c0_i32_0 : i32, i32
  }
  func.func @transform_6(%arg0: i32) -> (i32, i32) {
    %c0_i32 = arith.constant 0 : i32
    %c0_i32_0 = arith.constant 0 : i32
    %c0_i32_1 = arith.constant 0 : i32
    return %c0_i32, %c0_i32_0 : i32, i32
  }
  func.func @transform_7(%arg0: i32) -> (i32, i32) {
    %c0_i32 = arith.constant 0 : i32
    %c0_i32_0 = arith.constant 0 : i32
    %c0_i32_1 = arith.constant 0 : i32
    return %c0_i32, %c0_i32_0 : i32, i32
  }
  func.func @transform_8(%arg0: i32) -> (i32, i32) {
    %c0_i32 = arith.constant 0 : i32
    %c0_i32_0 = arith.constant 0 : i32
    %c0_i32_1 = arith.constant 0 : i32
    return %c0_i32, %c0_i32_0 : i32, i32
  }
  func.func @transform_9(%arg0: i32) -> (i32, i32) {
    %c0_i32 = arith.constant 0 : i32
    %c0_i32_0 = arith.constant 0 : i32
    %c0_i32_1 = arith.constant 0 : i32
    return %c0_i32, %c0_i32_0 : i32, i32
  }
  func.func @transform_10(%arg0: i32) -> (i32, i32) {
    %c0_i32 = arith.constant 0 : i32
    %c0_i32_0 = arith.constant 0 : i32
    %c0_i32_1 = arith.constant 0 : i32
    return %c0_i32, %c0_i32_0 : i32, i32
  }
  func.func @transform_11(%arg0: i32) -> (i32, i32) {
    %c0_i32 = arith.constant 0 : i32
    %c0_i32_0 = arith.constant 0 : i32
    %c0_i32_1 = arith.constant 0 : i32
    return %c0_i32, %c0_i32_0 : i32, i32
  }
  func.func @transform_12(%arg0: i32) -> (i32, i32) {
    %c0_i32 = arith.constant 0 : i32
    %c0_i32_0 = arith.constant 0 : i32
    %c0_i32_1 = arith.constant 0 : i32
    return %c0_i32, %c0_i32_0 : i32, i32
  }
  func.func @transform_13(%arg0: i32) -> (i32, i32) {
    %c0_i32 = arith.constant 0 : i32
    %c0_i32_0 = arith.constant 0 : i32
    return %arg0, %c0_i32 : i32, i32
  }
  func.func @transform_14(%arg0: i32) -> (i32, i32) {
    %c0_i32 = arith.constant 0 : i32
    %c0_i32_0 = arith.constant 0 : i32
    return %arg0, %c0_i32 : i32, i32
  }
}

</mosaic_0001>

<bundles_post_ra>
// kernel: vae_forward.1
= control target key start
LH: loop header
LB: loop body
LE: loop exit
PB: predicated region body
PF: predicated region fallthrough
CT: control target
= control target key end

     0   :  { %20 = vsyncpa [#allocation3], 0  ;;  %s2396_s0 = inlined_call_operand.vmem [shape: f32[8,256], index: 0, kind: input, shape index: {}]   ;;  %s2397_s1 = inlined_call_operand.hbm [shape: bf16[128,256], index: 1, kind: input, shape index: {}]   ;;  %s2398_s2 = inlined_call_operand.hbm [shape: f32[1,256], index: 2, kind: input, shape index: {}]   ;;  %s2399_s3 = inlined_call_operand.hbm [shape: bf16[256,256], index: 3, kind: input, shape index: {}]   ;;  %s2400_s4 = inlined_call_operand.hbm [shape: f32[1,256], index: 4, kind: input, shape index: {}]   ;;  %s2401_s5 = inlined_call_operand.hbm [shape: bf16[256,256], index: 5, kind: input, shape index: {}]   ;;  %s2402_s6 = inlined_call_operand.hbm [shape: f32[1,256], index: 6, kind: input, shape index: {}]   ;;  %s2403_s7 = inlined_call_operand.hbm [shape: bf16[128,256], index: 7, kind: input, shape index: {}]   ;;  %s2404_s8 = inlined_call_operand.hbm [shape: f32[1,256], index: 8, kind: input, shape index: {}]   ;;  %s2405_s9 = inlined_call_operand.hbm [shape: bf16[256,256], index: 9, kind: input, shape index: {}]   ;;  %s2406_s10 = inlined_call_operand.hbm [shape: f32[1,256], index: 10, kind: input, shape index: {}]   ;;  %s2407_s11 = inlined_call_operand.vmem [shape: bf16[256,128], index: 11, kind: input, shape index: {}]   ;;  %s2408_s12 = inlined_call_operand.vmem [shape: f32[1,128], index: 12, kind: input, shape index: {}]   ;;  %s2409_s13 = inlined_call_operand.hbm [shape: f32[8,128], index: 13, kind: output, shape index: {0}]   ;;  %s2410_s14 = inlined_call_operand.vmem [shape: f32[8,256], index: 14, kind: output, shape index: {1}]  }
   0x1   :  { %21 = vsyncpa [#allocation6], 0 }
   0x2   :  { %22 = vsyncpa [#allocation9], 0 }
   0x3   :  { %23 = vsyncpa [#allocation12], 0 }
   0x4   :  { %24 = vsyncpa [#allocation15], 0 }
   0x5   :  { %25 = vsyncpa [#allocation18], 0 }
   0x6   :  { %26 = vsyncpa [#allocation4], 0  ;;  %s2081_s29 = smov [#allocation5]   ;;  %s2082_s15 = smov [#allocation8]  }
   0x7   :  { %s47_s30 = sshll.u32 %s2081_s29, 4  ;;  %s69_s16 = sshll.u32 %s2082_s15, 4  ;;  %s48_s30 = int_to_ptr.vmem [resolvable:$true] %s47_s30  ;;  %s70_s16 = int_to_ptr.vmem [resolvable:$true] %s69_s16 }
   0x8   :  { %s1825_s19 = scalar_lea.hbm %s2398_s2, 32 }
   0x9   :  { %p1826_p0 = scmp.ne.s32.totalorder %s2398_s2, %s1825_s19  ;;  %p1829_p1 = scmp.lt.u32.totalorder %s1825_s19, %s2398_s2 }
   0xb   :  { %p1831_p2 = pnand %p1829_p1, %p1826_p0 }
   0xd   :  { %1834 = shalt.err (!%p1831_p2)
}
   0xe   :  { %s1835_s24 = scalar_lea.vmem %s48_s30, 32  ;;  %p1840_p4 = scmp.lt.s32.totalorder %s48_s30, %s48_s30 }
   0xf   :  { %p1836_p3 = scmp.ne.s32.totalorder %s48_s30, %s1835_s24  ;;  %p1841_p5 = scmp.lt.s32.totalorder %s1835_s24, %s1835_s24 }
  0x11   :  { %p1842_p6 = por %p1841_p5, %p1840_p4 }
  0x13   :  { %p1843_p7 = pnand %p1842_p6, %p1836_p3 }
  0x15   :  { %1846 = shalt.err (!%p1843_p7)
}
  0x16   :  { %50 = dma.hbm_to_vmem [thread:$0]  %s2398_s2, 32, %s48_s30, [#allocation6]  }
  0x17   :  { %s1847_s29 = scalar_lea.hbm %s2400_s4, 32 }
  0x18   :  { %p1848_p8 = scmp.ne.s32.totalorder %s2400_s4, %s1847_s29  ;;  %p1851_p9 = scmp.lt.u32.totalorder %s1847_s29, %s2400_s4 }
  0x1a   :  { %p1853_p10 = pnand %p1851_p9, %p1848_p8 }
  0x1c   :  { %1856 = shalt.err (!%p1853_p10)
}
  0x1d   :  { %s1857_s20 = scalar_lea.vmem %s70_s16, 32  ;;  %p1862_p12 = scmp.lt.s32.totalorder %s70_s16, %s70_s16 }
  0x1e   :  { %p1858_p11 = scmp.ne.s32.totalorder %s70_s16, %s1857_s20  ;;  %p1863_p13 = scmp.lt.s32.totalorder %s1857_s20, %s1857_s20 }
  0x20   :  { %p1864_p0 = por %p1863_p13, %p1862_p12 }
  0x22   :  { %p1865_p1 = pnand %p1864_p0, %p1858_p11 }
  0x24   :  { %1868 = shalt.err (!%p1865_p1)
}
  0x25   :  { %72 = dma.hbm_to_vmem [thread:$0]  %s2400_s4, 32, %s70_s16, [#allocation9]  }
  0x26   :  { %s2083_s21 = smov [#allocation11]   ;;  %s2084_s23 = smov [#allocation14]  }
  0x27   :  { %s91_s22 = sshll.u32 %s2083_s21, 4  ;;  %s113_s24 = sshll.u32 %s2084_s23, 4  ;;  %s92_s22 = int_to_ptr.vmem [resolvable:$true] %s91_s22  ;;  %s114_s24 = int_to_ptr.vmem [resolvable:$true] %s113_s24 }
  0x28   :  { %s1869_s27 = scalar_lea.hbm %s2402_s6, 32 }
  0x29   :  { %p1870_p2 = scmp.ne.s32.totalorder %s2402_s6, %s1869_s27  ;;  %p1873_p3 = scmp.lt.u32.totalorder %s1869_s27, %s2402_s6 }
  0x2b   :  { %p1875_p4 = pnand %p1873_p3, %p1870_p2 }
  0x2d   :  { %1878 = shalt.err (!%p1875_p4)
}
  0x2e   :  { %s1879_s4 = scalar_lea.vmem %s92_s22, 32  ;;  %p1884_p6 = scmp.lt.s32.totalorder %s92_s22, %s92_s22 }
  0x2f   :  { %p1880_p5 = scmp.ne.s32.totalorder %s92_s22, %s1879_s4  ;;  %p1885_p7 = scmp.lt.s32.totalorder %s1879_s4, %s1879_s4 }
  0x31   :  { %p1886_p8 = por %p1885_p7, %p1884_p6 }
  0x33   :  { %p1887_p9 = pnand %p1886_p8, %p1880_p5 }
  0x35   :  { %1890 = shalt.err (!%p1887_p9)
}
  0x36   :  { %94 = dma.hbm_to_vmem [thread:$0]  %s2402_s6, 32, %s92_s22, [#allocation12]  }
  0x37   :  { %s1891_s2 = scalar_lea.hbm %s2404_s8, 32 }
  0x38   :  { %p1892_p10 = scmp.ne.s32.totalorder %s2404_s8, %s1891_s2  ;;  %p1895_p11 = scmp.lt.u32.totalorder %s1891_s2, %s2404_s8 }
  0x3a   :  { %p1897_p12 = pnand %p1895_p11, %p1892_p10 }
  0x3c   :  { %1900 = shalt.err (!%p1897_p12)
}
  0x3d   :  { %s1901_s26 = scalar_lea.vmem %s114_s24, 32  ;;  %p1906_p0 = scmp.lt.s32.totalorder %s114_s24, %s114_s24 }
  0x3e   :  { %p1902_p13 = scmp.ne.s32.totalorder %s114_s24, %s1901_s26  ;;  %p1907_p1 = scmp.lt.s32.totalorder %s1901_s26, %s1901_s26 }
  0x40   :  { %p1908_p2 = por %p1907_p1, %p1906_p0 }
  0x42   :  { %p1909_p3 = pnand %p1908_p2, %p1902_p13 }
  0x44   :  { %1912 = shalt.err (!%p1909_p3)
}
  0x45   :  { %116 = dma.hbm_to_vmem [thread:$0]  %s2404_s8, 32, %s114_s24, [#allocation15]  }
  0x46   :  { %s2085_s27 = smov [#allocation2]   ;;  %s1913_s17 = scalar_lea.hbm %s2397_s1, 2048 }
  0x47   :  { %s34_s28 = sshll.u32 %s2085_s27, 4  ;;  %p1914_p4 = scmp.ne.s32.totalorder %s2397_s1, %s1913_s17  ;;  %s35_s28 = int_to_ptr.vmem [resolvable:$true] %s34_s28 }
  0x48   :  { %p1917_p5 = scmp.lt.u32.totalorder %s1913_s17, %s2397_s1 }
  0x4a   :  { %p1919_p6 = pnand %p1917_p5, %p1914_p4 }
  0x4c   :  { %1922 = shalt.err (!%p1919_p6)
}
  0x4d   :  { %s1923_s20 = scalar_lea.vmem %s35_s28, 2048  ;;  %p1928_p8 = scmp.lt.s32.totalorder %s35_s28, %s35_s28 }
  0x4e   :  { %p1924_p7 = scmp.ne.s32.totalorder %s35_s28, %s1923_s20  ;;  %p1929_p9 = scmp.lt.s32.totalorder %s1923_s20, %s1923_s20 }
  0x50   :  { %p1930_p10 = por %p1929_p9, %p1928_p8 }
  0x52   :  { %p1931_p11 = pnand %p1930_p10, %p1924_p7 }
  0x54   :  { %1934 = shalt.err (!%p1931_p11)
}
  0x55   :  { %s2086_s8 = smov 128   ;;  %s2087_s24 = smov 8  }
  0x56   :  { %40 = dma.hbm_to_vmem [thread:$0]  %s2397_s1, 2048, %s35_s28, [#allocation3], %s2086_s8, %s2086_s8, %s2087_s24  }
  0x57   :  { %s2088_s21 = smov [#allocation7]   ;;  %s2089_s25 = smov [#allocation10]  }
  0x58   :  { %s56_s23 = sshll.u32 %s2088_s21, 4  ;;  %s78_s26 = sshll.u32 %s2089_s25, 4  ;;  %s57_s23 = int_to_ptr.vmem [resolvable:$true] %s56_s23  ;;  %s79_s26 = int_to_ptr.vmem [resolvable:$true] %s78_s26 }
  0x59   :  { %s1935_s27 = scalar_lea.hbm %s2399_s3, 4096 }
  0x5a   :  { %p1936_p12 = scmp.ne.s32.totalorder %s2399_s3, %s1935_s27  ;;  %p1939_p13 = scmp.lt.u32.totalorder %s1935_s27, %s2399_s3 }
  0x5c   :  { %p1941_p0 = pnand %p1939_p13, %p1936_p12 }
  0x5e   :  { %1944 = shalt.err (!%p1941_p0)
}
  0x5f   :  { %s1945_s1 = scalar_lea.vmem %s57_s23, 4096  ;;  %p1950_p2 = scmp.lt.s32.totalorder %s57_s23, %s57_s23 }
  0x60   :  { %p1946_p1 = scmp.ne.s32.totalorder %s57_s23, %s1945_s1  ;;  %p1951_p3 = scmp.lt.s32.totalorder %s1945_s1, %s1945_s1 }
  0x62   :  { %p1952_p4 = por %p1951_p3, %p1950_p2 }
  0x64   :  { %p1953_p5 = pnand %p1952_p4, %p1946_p1 }
  0x66   :  { %1956 = shalt.err (!%p1953_p5)
}
  0x67   :  { %62 = dma.hbm_to_vmem [thread:$0]  %s2399_s3, 4096, %s57_s23, [#allocation6], %s2086_s8, %s2086_s8, %s2087_s24  }
  0x68   :  { %s1957_s20 = scalar_lea.hbm %s2401_s5, 4096 }
  0x69   :  { %p1958_p6 = scmp.ne.s32.totalorder %s2401_s5, %s1957_s20  ;;  %p1961_p7 = scmp.lt.u32.totalorder %s1957_s20, %s2401_s5 }
  0x6b   :  { %p1963_p8 = pnand %p1961_p7, %p1958_p6 }
  0x6d   :  { %1966 = shalt.err (!%p1963_p8)
}
  0x6e   :  { %s1967_s6 = scalar_lea.vmem %s79_s26, 4096  ;;  %p1972_p10 = scmp.lt.s32.totalorder %s79_s26, %s79_s26 }
  0x6f   :  { %p1968_p9 = scmp.ne.s32.totalorder %s79_s26, %s1967_s6  ;;  %p1973_p11 = scmp.lt.s32.totalorder %s1967_s6, %s1967_s6 }
  0x71   :  { %p1974_p12 = por %p1973_p11, %p1972_p10 }
  0x73   :  { %p1975_p13 = pnand %p1974_p12, %p1968_p9 }
  0x75   :  { %1978 = shalt.err (!%p1975_p13)
}
  0x76   :  { %84 = dma.hbm_to_vmem [thread:$0]  %s2401_s5, 4096, %s79_s26, [#allocation9], %s2086_s8, %s2086_s8, %s2087_s24  }
  0x77   :  { %s2090_s22 = smov [#allocation13]   ;;  %s2091_s29 = smov [#allocation16]  }
  0x78   :  { %s100_s27 = sshll.u32 %s2090_s22, 4  ;;  %s122_s15 = sshll.u32 %s2091_s29, 4  ;;  %s101_s27 = int_to_ptr.vmem [resolvable:$true] %s100_s27  ;;  %s123_s15 = int_to_ptr.vmem [resolvable:$true] %s122_s15 }
  0x79   :  { %s1979_s1 = scalar_lea.hbm %s2403_s7, 2048 }
  0x7a   :  { %p1980_p0 = scmp.ne.s32.totalorder %s2403_s7, %s1979_s1  ;;  %p1983_p1 = scmp.lt.u32.totalorder %s1979_s1, %s2403_s7 }
  0x7c   :  { %p1985_p2 = pnand %p1983_p1, %p1980_p0 }
  0x7e   :  { %1988 = shalt.err (!%p1985_p2)
}
  0x7f   :  { %s1989_s5 = scalar_lea.vmem %s101_s27, 2048  ;;  %p1994_p4 = scmp.lt.s32.totalorder %s101_s27, %s101_s27 }
  0x80   :  { %p1990_p3 = scmp.ne.s32.totalorder %s101_s27, %s1989_s5  ;;  %p1995_p5 = scmp.lt.s32.totalorder %s1989_s5, %s1989_s5 }
  0x82   :  { %p1996_p6 = por %p1995_p5, %p1994_p4 }
  0x84   :  { %p1997_p7 = pnand %p1996_p6, %p1990_p3 }
  0x86   :  { %2000 = shalt.err (!%p1997_p7)
}
  0x87   :  { %106 = dma.hbm_to_vmem [thread:$0]  %s2403_s7, 2048, %s101_s27, [#allocation12], %s2086_s8, %s2086_s8, %s2087_s24  }
  0x88   :  { %s2001_s21 = scalar_lea.hbm %s2405_s9, 4096 }
  0x89   :  { %p2002_p8 = scmp.ne.s32.totalorder %s2405_s9, %s2001_s21  ;;  %p2005_p9 = scmp.lt.u32.totalorder %s2001_s21, %s2405_s9 }
  0x8b   :  { %p2007_p10 = pnand %p2005_p9, %p2002_p8 }
  0x8d   :  { %2010 = shalt.err (!%p2007_p10)
}
  0x8e   :  { %s2011_s22 = scalar_lea.vmem %s123_s15, 4096  ;;  %p2016_p12 = scmp.lt.s32.totalorder %s123_s15, %s123_s15 }
  0x8f   :  { %p2012_p11 = scmp.ne.s32.totalorder %s123_s15, %s2011_s22  ;;  %p2017_p13 = scmp.lt.s32.totalorder %s2011_s22, %s2011_s22 }
  0x91   :  { %p2018_p0 = por %p2017_p13, %p2016_p12 }
  0x93   :  { %p2019_p1 = pnand %p2018_p0, %p2012_p11 }
  0x95   :  { %2022 = shalt.err (!%p2019_p1)
}
  0x96   :  { %128 = dma.hbm_to_vmem [thread:$0]  %s2405_s9, 4096, %s123_s15, [#allocation15], %s2086_s8, %s2086_s8, %s2087_s24  }
  0x97   :  { %s2092_s29 = smov [#allocation17]   ;;  %s2023_s28 = scalar_lea.hbm %s2406_s10, 32 }
  0x98   :  { %s135_s17 = sshll.u32 %s2092_s29, 4  ;;  %p2024_p2 = scmp.ne.s32.totalorder %s2406_s10, %s2023_s28  ;;  %s136_s17 = int_to_ptr.vmem [resolvable:$true] %s135_s17 }
  0x99   :  { %p2027_p3 = scmp.lt.u32.totalorder %s2023_s28, %s2406_s10 }
  0x9b   :  { %p2029_p4 = pnand %p2027_p3, %p2024_p2 }
  0x9d   :  { %2032 = shalt.err (!%p2029_p4)
}
  0x9e   :  { %s2033_s26 = scalar_lea.vmem %s136_s17, 32  ;;  %p2038_p6 = scmp.lt.s32.totalorder %s136_s17, %s136_s17 }
  0x9f   :  { %p2034_p5 = scmp.ne.s32.totalorder %s136_s17, %s2033_s26  ;;  %p2039_p7 = scmp.lt.s32.totalorder %s2033_s26, %s2033_s26 }
  0xa1   :  { %p2040_p8 = por %p2039_p7, %p2038_p6 }
  0xa3   :  { %p2041_p9 = pnand %p2040_p8, %p2034_p5 }
  0xa5   :  { %2044 = shalt.err (!%p2041_p9)
}
  0xa6   :  { %138 = dma.hbm_to_vmem [thread:$0]  %s2406_s10, 32, %s136_s17, [#allocation18]  }
  0xa7   :  { %2067 = dma.done.wait [#allocation3], 2048  }
  0xa8   :  { %2068 = vsyncadd [#allocation3], 4294965248 }
  0xa9   :  { %2069 = dma.done.wait [#allocation6], 4128  }
  0xaa   :  { %2070 = vsyncadd [#allocation6], 4294963168 }
  0xab   :  { %2071 = dma.done.wait [#allocation9], 4128  }
  0xac   :  { %2072 = vsyncadd [#allocation9], 4294963168 }
  0xad   :  { %2073 = dma.done.wait [#allocation12], 2080  }
  0xae   :  { %2074 = vsyncadd [#allocation12], 4294965216 }
  0xaf   :  { %2075 = dma.done.wait [#allocation15], 4128  }
  0xb0   :  { %2076 = vsyncadd [#allocation15], 4294963168 }
  0xb1   :  { %2077 = dma.done.wait [#allocation18], 32  }
  0xb2   :  { %2078 = vsyncadd [#allocation18], 4294967264  ;;  %v2093_v0 = vmov 0   ;;  %v1615_v1 = vld [vmem:[#allocation2 + $0x4] ss:$8 sps:$4 sm:$0xff]   ;;  %s2094_s22 = smov [#allocation19]  }
  0xb3   :  { %317 = vmatprep.mubr.bf16.mxu0 %v2093_v0  ;;  %v1617_v2 = vld [vmem:[#allocation2] ss:$8 sps:$4 sm:$0xff]   ;;  %285 = vmatprep.subr.bf16.mxu0 %v1615_v1  ;;  %v1618_v3 = vld [vmem:[#allocation2 + $0x14] ss:$8 sps:$4 sm:$0xff]   ;;  %v1620_v4 = vld [vmem:[#allocation2 + $0x10] ss:$8 sps:$4 sm:$0xff]  }
  0xb4   :  { %286 = vmatpush1.bf16.msra.mxu0 %v1617_v2  ;;  %v1621_v5 = vld [vmem:[#allocation2 + $0x24] ss:$8 sps:$4 sm:$0xff]   ;;  %v1623_v6 = vld [vmem:[#allocation2 + $0x20] ss:$8 sps:$4 sm:$0xff]   ;;  %v1624_v7 = vld [vmem:[#allocation2 + $0x34] ss:$8 sps:$4 sm:$0xff]  }
  0xb5   :  { %287 = vmatprep.subr.bf16.mxu0 %v1618_v3  ;;  %v1626_v8 = vld [vmem:[#allocation2 + $0x30] ss:$8 sps:$4 sm:$0xff]   ;;  %v1627_v9 = vld [vmem:[#allocation2 + $0x44] ss:$8 sps:$4 sm:$0xff]   ;;  %v1629_v13 = vld [vmem:[#allocation2 + $0x40] ss:$8 sps:$4 sm:$0xff]  }
  0xb6   :  { %v1639_v10 = vld [vmem:[#allocation7 + $0x4] ss:$8 sps:$4 sm:$0xff]   ;;  %v1641_v11 = vld [vmem:[#allocation7] ss:$8 sps:$4 sm:$0xff]   ;;  %v1642_v12 = vld [vmem:[#allocation7 + $0x14] ss:$8 sps:$4 sm:$0xff]  }
  0xb7   :  { %534 = vmatprep.subr.bf16.mxu1 %v1639_v10  ;;  %v1644_v14 = vld [vmem:[#allocation7 + $0x10] ss:$8 sps:$4 sm:$0xff]   ;;  %v1645_v15 = vld [vmem:[#allocation7 + $0x24] ss:$8 sps:$4 sm:$0xff]   ;;  %v1647_v18 = vld [vmem:[#allocation7 + $0x20] ss:$8 sps:$4 sm:$0xff]  }
  0xb8   :  { %288 = vmatpush1.bf16.msra.mxu0 %v1620_v4  ;;  %535 = vmatpush1.bf16.msra.mxu1 %v1641_v11  ;;  %v1630_v16 = vld [vmem:[#allocation2 + $0x54] ss:$8 sps:$4 sm:$0xff]   ;;  %v1632_v17 = vld [vmem:[#allocation2 + $0x50] ss:$8 sps:$4 sm:$0xff]   ;;  %v1633_v20 = vld [vmem:[#allocation2 + $0x64] ss:$8 sps:$4 sm:$0xff]  }
  0xb9   :  { %289 = vmatprep.subr.bf16.mxu0 %v1621_v5  ;;  %536 = vmatprep.subr.bf16.mxu1 %v1642_v12  ;;  %v1648_v19 = vld [vmem:[#allocation7 + $0x34] ss:$8 sps:$4 sm:$0xff]   ;;  %v1650_v22 = vld [vmem:[#allocation7 + $0x30] ss:$8 sps:$4 sm:$0xff]   ;;  %v1651_v23 = vld [vmem:[#allocation7 + $0x44] ss:$8 sps:$4 sm:$0xff]  }
  0xba   :  { %v1635_v21 = vld [vmem:[#allocation2 + $0x60] ss:$8 sps:$4 sm:$0xff]   ;;  %v1636_v24 = vld [vmem:[#allocation2 + $0x74] ss:$8 sps:$4 sm:$0xff]   ;;  %v1638_v25 = vld [vmem:[#allocation2 + $0x70] ss:$8 sps:$4 sm:$0xff]  }
  0xbb   :  { %v174_v26 = vld [vmem:[%s2396_s0] sm:$0xff]  ;;  %v1656_v29 = vld [vmem:[#allocation7 + $0x50] ss:$8 sps:$4 sm:$0xff]   ;;  %s1416_s7 = sshll.u32 %s2094_s22, 4  ;;  %s1417_s7 = int_to_ptr.vmem [resolvable:$true] %s1416_s7 }
  0xbc   :  { %290 = vmatpush1.bf16.msra.mxu0 %v1623_v6  ;;  %537 = vmatpush1.bf16.msra.mxu1 %v1644_v14  ;;  %v1653_v27 = vld [vmem:[#allocation7 + $0x40] ss:$8 sps:$4 sm:$0xff]   ;;  %v1654_v28 = vld [vmem:[#allocation7 + $0x54] ss:$8 sps:$4 sm:$0xff]   ;;  %v1657_v30 = vld [vmem:[#allocation7 + $0x64] ss:$8 sps:$4 sm:$0xff]   ;;  %v176_v31 = vpack.c.bf16 %v174_v26, %v174_v26  ;;  %p2050_p11 = scmp.lt.s32.totalorder %s1417_s7, %s1417_s7 }
  0xbd   :  { %291 = vmatprep.subr.bf16.mxu0 %v1624_v7  ;;  %538 = vmatprep.subr.bf16.mxu1 %v1645_v15  ;;  %v1659_v32 = vld [vmem:[#allocation7 + $0x60] ss:$8 sps:$4 sm:$0xff]   ;;  %v1660_v33 = vld [vmem:[#allocation7 + $0x74] ss:$8 sps:$4 sm:$0xff]   ;;  %v1662_v34 = vld [vmem:[#allocation7 + $0x70] ss:$8 sps:$4 sm:$0xff]  }
  0xbe   :  { %v1663_v35 = vld [vmem:[#allocation7 + $0x84] ss:$8 sps:$4 sm:$0xff]   ;;  %v1665_v36 = vld [vmem:[#allocation7 + $0x80] ss:$8 sps:$4 sm:$0xff]   ;;  %v1666_v37 = vld [vmem:[#allocation7 + $0x94] ss:$8 sps:$4 sm:$0xff]  }
  0xbf   :  { %v1668_v38 = vld [vmem:[#allocation7 + $0x90] ss:$8 sps:$4 sm:$0xff]   ;;  %v1669_v39 = vld [vmem:[#allocation7 + $0xa4] ss:$8 sps:$4 sm:$0xff]   ;;  %v1671_v40 = vld [vmem:[#allocation7 + $0xa0] ss:$8 sps:$4 sm:$0xff]  }
  0xc0   :  { %292 = vmatpush1.bf16.msra.mxu0 %v1626_v8  ;;  %539 = vmatpush1.bf16.msra.mxu1 %v1647_v18  ;;  %v1672_v41 = vld [vmem:[#allocation7 + $0xb4] ss:$8 sps:$4 sm:$0xff]   ;;  %v1674_v42 = vld [vmem:[#allocation7 + $0xb0] ss:$8 sps:$4 sm:$0xff]   ;;  %v1675_v43 = vld [vmem:[#allocation7 + $0xc4] ss:$8 sps:$4 sm:$0xff]  }
  0xc1   :  { %293 = vmatprep.subr.bf16.mxu0 %v1627_v9  ;;  %540 = vmatprep.subr.bf16.mxu1 %v1648_v19  ;;  %v1677_v44 = vld [vmem:[#allocation7 + $0xc0] ss:$8 sps:$4 sm:$0xff]   ;;  %v1678_v45 = vld [vmem:[#allocation7 + $0xd4] ss:$8 sps:$4 sm:$0xff]   ;;  %v1680_v46 = vld [vmem:[#allocation7 + $0xd0] ss:$8 sps:$4 sm:$0xff]  }
  0xc2   :  { %v1681_v47 = vld [vmem:[#allocation7 + $0xe4] ss:$8 sps:$4 sm:$0xff]   ;;  %v1683_v48 = vld [vmem:[#allocation7 + $0xe0] ss:$8 sps:$4 sm:$0xff]   ;;  %v1684_v49 = vld [vmem:[#allocation7 + $0xf4] ss:$8 sps:$4 sm:$0xff]  }
  0xc3   :  { %v1686_v50 = vld [vmem:[#allocation7 + $0xf0] ss:$8 sps:$4 sm:$0xff]   ;;  %v1687_v51 = vld [vmem:[#allocation10] ss:$8 sps:$4 sm:$0xff]   ;;  %v193_v19 = vld [vmem:[#allocation5] sm:$0x3] }
  0xc4   :  { %294 = vmatpush1.bf16.msra.mxu0 %v1629_v13  ;;  %541 = vmatpush1.bf16.msra.mxu1 %v1650_v22  ;;  %v1689_v52 = vld [vmem:[#allocation10 + $0x4] ss:$8 sps:$4 sm:$0xff]   ;;  %v1692_v53 = vld [vmem:[#allocation10 + $0x14] ss:$8 sps:$4 sm:$0xff]   ;;  %v1690_v54 = vld [vmem:[#allocation10 + $0x10] ss:$8 sps:$4 sm:$0xff]  }
  0xc5   :  { %295 = vmatprep.subr.bf16.mxu0 %v1630_v16  ;;  %542 = vmatprep.subr.bf16.mxu1 %v1651_v23  ;;  %v1695_v55 = vld [vmem:[#allocation10 + $0x24] ss:$8 sps:$4 sm:$0xff]   ;;  %v1693_v56 = vld [vmem:[#allocation10 + $0x20] ss:$8 sps:$4 sm:$0xff]   ;;  %v1698_v57 = vld [vmem:[#allocation10 + $0x34] ss:$8 sps:$4 sm:$0xff]   ;;  %v195_v16 = vlaneseq }
  0xc6   :  { %v1696_v58 = vld [vmem:[#allocation10 + $0x30] ss:$8 sps:$4 sm:$0xff]   ;;  %v1701_v59 = vld [vmem:[#allocation10 + $0x44] ss:$8 sps:$4 sm:$0xff]   ;;  %v1699_v60 = vld [vmem:[#allocation10 + $0x40] ss:$8 sps:$4 sm:$0xff]  }
  0xc7   :  { %v1704_v61 = vld [vmem:[#allocation10 + $0x54] ss:$8 sps:$4 sm:$0xff]   ;;  %v1702_v62 = vld [vmem:[#allocation10 + $0x50] ss:$8 sps:$4 sm:$0xff]   ;;  %v1707_v63 = vld [vmem:[#allocation10 + $0x64] ss:$8 sps:$4 sm:$0xff]  }
  0xc8   :  { %296 = vmatpush1.bf16.msra.mxu0 %v1632_v17  ;;  %543 = vmatpush1.bf16.msra.mxu1 %v1653_v27  ;;  %v1705_v1 = vld [vmem:[#allocation10 + $0x60] ss:$8 sps:$4 sm:$0xff]   ;;  %v1710_v2 = vld [vmem:[#allocation10 + $0x74] ss:$8 sps:$4 sm:$0xff]   ;;  %v1708_v3 = vld [vmem:[#allocation10 + $0x70] ss:$8 sps:$4 sm:$0xff]  }
  0xc9   :  { %297 = vmatprep.subr.bf16.mxu0 %v1633_v20  ;;  %544 = vmatprep.subr.bf16.mxu1 %v1654_v28  ;;  %v1713_v4 = vld [vmem:[#allocation10 + $0x84] ss:$8 sps:$4 sm:$0xff]   ;;  %v1711_v5 = vld [vmem:[#allocation10 + $0x80] ss:$8 sps:$4 sm:$0xff]   ;;  %v1716_v6 = vld [vmem:[#allocation10 + $0x94] ss:$8 sps:$4 sm:$0xff]  }
  0xca   :  { %v1714_v7 = vld [vmem:[#allocation10 + $0x90] ss:$8 sps:$4 sm:$0xff]   ;;  %v1719_v8 = vld [vmem:[#allocation10 + $0xa4] ss:$8 sps:$4 sm:$0xff]   ;;  %v1717_v9 = vld [vmem:[#allocation10 + $0xa0] ss:$8 sps:$4 sm:$0xff]  }
  0xcb   :  { %v1722_v10 = vld [vmem:[#allocation10 + $0xb4] ss:$8 sps:$4 sm:$0xff]   ;;  %v1720_v11 = vld [vmem:[#allocation10 + $0xb0] ss:$8 sps:$4 sm:$0xff]   ;;  %v1725_v12 = vld [vmem:[#allocation10 + $0xc4] ss:$8 sps:$4 sm:$0xff]  }
  0xcc   :  { %298 = vmatpush1.bf16.msra.mxu0 %v1635_v21  ;;  %545 = vmatpush1.bf16.msra.mxu1 %v1656_v29  ;;  %v1723_v13 = vld [vmem:[#allocation10 + $0xc0] ss:$8 sps:$4 sm:$0xff]   ;;  %v1728_v14 = vld [vmem:[#allocation10 + $0xd4] ss:$8 sps:$4 sm:$0xff]   ;;  %v1726_v15 = vld [vmem:[#allocation10 + $0xd0] ss:$8 sps:$4 sm:$0xff]  }
  0xcd   :  { %299 = vmatprep.subr.bf16.mxu0 %v1636_v24  ;;  %546 = vmatprep.subr.bf16.mxu1 %v1657_v30  ;;  %v196_v17 = vshrl.u32 %v195_v16, 7  ;;  %v1782_v16 = vld [vmem:[#allocation16 + $0x74] ss:$8 sps:$4 sm:$0xff]   ;;  %s2045_s27 = scalar_lea.vmem %s1417_s7, 128 }
  0xce   :  { %p2046_p10 = scmp.ne.s32.totalorder %s1417_s7, %s2045_s27  ;;  %p2051_p12 = scmp.lt.s32.totalorder %s2045_s27, %s2045_s27 }
  0xcf   :  { %v2309_v18 = vsub.s32 0, %v196_v17  ;;  %v2311_v20 = vsub.s32 1, %v196_v17  ;;  %v1780_v17 = vld [vmem:[#allocation16 + $0x70] ss:$8 sps:$4 sm:$0xff]  }
  0xd0   :  { %300 = vmatpush1.bf16.msra.mxu0 %v1638_v25  ;;  %547 = vmatpush1.bf16.msra.mxu1 %v1659_v32  ;;  %p2052_p13 = por %p2051_p12, %p2050_p11 }
  0xd1   :  { %548 = vmatprep.subr.bf16.mxu1 %v1660_v33  ;;  %783 = vmatprep.subr.bf16.mxu0 %v1689_v52  ;;  %v198_v21 = vrot.slane %v193_v19, %v2309_v18  ;;  %v202_v22 = vrot.slane %v193_v19, %v2311_v20  ;;  %v1731_v33 = vld [vmem:[#allocation10 + $0xe4] ss:$8 sps:$4 sm:$0xff]   ;;  %v1785_v19 = vld [vmem:[#allocation16 + $0x84] ss:$8 sps:$4 sm:$0xff]  }
  0xd2   :  { %p2053_p0 = pnand %p2052_p13, %p2046_p10 }
  0xd3   :  { %318 = vmatmul.mubr.bf16.vlgmr.msra.gmra.mrb[0].mxu0 %v176_v31 }
  0xd4   :  { %549 = vmatpush1.bf16.msra.mxu1 %v1662_v34  ;;  %784 = vmatpush1.bf16.msra.mxu0 %v1687_v51  ;;  %v1729_v34 = vld [vmem:[#allocation10 + $0xe0] ss:$8 sps:$4 sm:$0xff]  }
  0xd5   :  { %550 = vmatprep.subr.bf16.mxu1 %v1663_v35  ;;  %785 = vmatprep.subr.bf16.mxu0 %v1692_v53  ;;  %v1734_v35 = vld [vmem:[#allocation10 + $0xf4] ss:$8 sps:$4 sm:$0xff]   ;;  %v1743_v53 = vld [vmem:[#allocation13 + $0x24] ss:$8 sps:$4 sm:$0xff]  }
  0xd8   :  { %551 = vmatpush1.bf16.msra.mxu1 %v1665_v36  ;;  %786 = vmatpush1.bf16.msra.mxu0 %v1690_v54  ;;  %v1732_v36 = vld [vmem:[#allocation10 + $0xf0] ss:$8 sps:$4 sm:$0xff]   ;;  %v1741_v54 = vld [vmem:[#allocation13 + $0x20] ss:$8 sps:$4 sm:$0xff]  }
  0xd9   :  { %552 = vmatprep.subr.bf16.mxu1 %v1666_v37  ;;  %787 = vmatprep.subr.bf16.mxu0 %v1695_v55  ;;  %v1735_v37 = vld [vmem:[#allocation13] ss:$8 sps:$4 sm:$0xff]   ;;  %v1746_v55 = vld [vmem:[#allocation13 + $0x34] ss:$8 sps:$4 sm:$0xff]  }
  0xdc   :  { %553 = vmatpush1.bf16.msra.mxu1 %v1668_v38  ;;  %788 = vmatpush1.bf16.msra.mxu0 %v1693_v56  ;;  %v1737_v38 = vld [vmem:[#allocation13 + $0x4] ss:$8 sps:$4 sm:$0xff]   ;;  %v1744_v56 = vld [vmem:[#allocation13 + $0x30] ss:$8 sps:$4 sm:$0xff]  }
  0xdd   :  { %554 = vmatprep.subr.bf16.mxu1 %v1669_v39  ;;  %789 = vmatprep.subr.bf16.mxu0 %v1698_v57  ;;  %v1740_v39 = vld [vmem:[#allocation13 + $0x14] ss:$8 sps:$4 sm:$0xff]   ;;  %v1749_v57 = vld [vmem:[#allocation13 + $0x44] ss:$8 sps:$4 sm:$0xff]  }
  0xe0   :  { %555 = vmatpush1.bf16.msra.mxu1 %v1671_v40  ;;  %790 = vmatpush1.bf16.msra.mxu0 %v1696_v58  ;;  %v1738_v40 = vld [vmem:[#allocation13 + $0x10] ss:$8 sps:$4 sm:$0xff]   ;;  %v1747_v58 = vld [vmem:[#allocation13 + $0x40] ss:$8 sps:$4 sm:$0xff]  }
  0xe1   :  { %556 = vmatprep.subr.bf16.mxu1 %v1672_v41  ;;  %791 = vmatprep.subr.bf16.mxu0 %v1701_v59  ;;  %v362_v41 = vld [vmem:[#allocation8] sm:$0x3] }
  0xe2   :  { %v1752_v59 = vld [vmem:[#allocation13 + $0x54] ss:$8 sps:$4 sm:$0xff]  }
  0xe4   :  { %557 = vmatpush1.bf16.msra.mxu1 %v1674_v42  ;;  %792 = vmatpush1.bf16.msra.mxu0 %v1699_v60  ;;  %v367_v42 = vrot.slane %v362_v41, %v2309_v18  ;;  %v1750_v60 = vld [vmem:[#allocation13 + $0x50] ss:$8 sps:$4 sm:$0xff]  }
  0xe5   :  { %558 = vmatprep.subr.bf16.mxu1 %v1675_v43  ;;  %793 = vmatprep.subr.bf16.mxu0 %v1704_v61  ;;  %v1755_v61 = vld [vmem:[#allocation13 + $0x64] ss:$8 sps:$4 sm:$0xff]  }
  0xe8   :  { %559 = vmatpush1.bf16.msra.mxu1 %v1677_v44  ;;  %794 = vmatpush1.bf16.msra.mxu0 %v1702_v62  ;;  %v1753_v62 = vld [vmem:[#allocation13 + $0x60] ss:$8 sps:$4 sm:$0xff]  }
  0xe9   :  { %560 = vmatprep.subr.bf16.mxu1 %v1678_v45  ;;  %795 = vmatprep.subr.bf16.mxu0 %v1707_v63  ;;  %v1758_v63 = vld [vmem:[#allocation13 + $0x74] ss:$8 sps:$4 sm:$0xff]  }
  0xec   :  { %561 = vmatpush1.bf16.msra.mxu1 %v1680_v46  ;;  %796 = vmatpush1.bf16.msra.mxu0 %v1705_v1  ;;  %v1756_v1 = vld [vmem:[#allocation13 + $0x70] ss:$8 sps:$4 sm:$0xff]  }
  0xed   :  { %562 = vmatprep.subr.bf16.mxu1 %v1681_v47  ;;  %797 = vmatprep.subr.bf16.mxu0 %v1710_v2  ;;  %v1759_v2 = vld [vmem:[#allocation16] ss:$8 sps:$4 sm:$0xff]  }
  0xf0   :  { %563 = vmatpush1.bf16.msra.mxu1 %v1683_v48  ;;  %798 = vmatpush1.bf16.msra.mxu0 %v1708_v3  ;;  %v1761_v3 = vld [vmem:[#allocation16 + $0x4] ss:$8 sps:$4 sm:$0xff]  }
  0xf1   :  { %564 = vmatprep.subr.bf16.mxu1 %v1684_v49  ;;  %799 = vmatprep.subr.bf16.mxu0 %v1713_v4  ;;  %v1764_v4 = vld [vmem:[#allocation16 + $0x14] ss:$8 sps:$4 sm:$0xff]  }
  0xf4   :  { %565 = vmatpush1.bf16.msra.mxu1 %v1686_v50  ;;  %800 = vmatpush1.bf16.msra.mxu0 %v1711_v5  ;;  %v1762_v5 = vld [vmem:[#allocation16 + $0x10] ss:$8 sps:$4 sm:$0xff]  }
  0xf5   :  { %801 = vmatprep.subr.bf16.mxu0 %v1716_v6  ;;  %938 = vmatprep.subr.bf16.mxu1 %v1737_v38  ;;  %v1767_v6 = vld [vmem:[#allocation16 + $0x24] ss:$8 sps:$4 sm:$0xff]  }
  0xf8   :  { %802 = vmatpush1.bf16.msra.mxu0 %v1714_v7  ;;  %v1765_v7 = vld [vmem:[#allocation16 + $0x20] ss:$8 sps:$4 sm:$0xff]  }
  0xf9   :  { %803 = vmatprep.subr.bf16.mxu0 %v1719_v8  ;;  %v1770_v8 = vld [vmem:[#allocation16 + $0x34] ss:$8 sps:$4 sm:$0xff]  }
  0xfc   :  { %804 = vmatpush1.bf16.msra.mxu0 %v1717_v9  ;;  %v1768_v9 = vld [vmem:[#allocation16 + $0x30] ss:$8 sps:$4 sm:$0xff]  }
  0xfd   :  { %805 = vmatprep.subr.bf16.mxu0 %v1722_v10  ;;  %v1773_v10 = vld [vmem:[#allocation16 + $0x44] ss:$8 sps:$4 sm:$0xff]  }
 0x100   :  { %806 = vmatpush1.bf16.msra.mxu0 %v1720_v11  ;;  %v1771_v11 = vld [vmem:[#allocation16 + $0x40] ss:$8 sps:$4 sm:$0xff]  }
 0x101   :  { %807 = vmatprep.subr.bf16.mxu0 %v1725_v12  ;;  %v1776_v12 = vld [vmem:[#allocation16 + $0x54] ss:$8 sps:$4 sm:$0xff]  }
 0x104   :  { %808 = vmatpush1.bf16.msra.mxu0 %v1723_v13  ;;  %v1774_v13 = vld [vmem:[#allocation16 + $0x50] ss:$8 sps:$4 sm:$0xff]  }
 0x105   :  { %809 = vmatprep.subr.bf16.mxu0 %v1728_v14  ;;  %v1779_v14 = vld [vmem:[#allocation16 + $0x64] ss:$8 sps:$4 sm:$0xff]  }
 0x108   :  { %810 = vmatpush1.bf16.msra.mxu0 %v1726_v15  ;;  %v1777_v15 = vld [vmem:[#allocation16 + $0x60] ss:$8 sps:$4 sm:$0xff]  }
 0x109   :  { %811 = vmatprep.subr.bf16.mxu0 %v1731_v33 }
 0x10c   :  { %812 = vmatpush1.bf16.msra.mxu0 %v1729_v34 }
 0x10d   :  { %813 = vmatprep.subr.bf16.mxu0 %v1734_v35 }
 0x110   :  { %814 = vmatpush1.bf16.msra.mxu0 %v1732_v36 }
 0x111   :  { %1187 = vmatprep.subr.bf16.mxu0 %v1761_v3 }
 0x1a6   :  { %v319_v23 = vpop.f32.mrb[0].mxu0 }
 0x1a7   :  { %v320_v24 = vadd.f32 %v319_v23, %v198_v21  ;;  %v321_v25 = vpop.f32.mrb[1].mxu0  ;;  %v1783_v21 = vld [vmem:[#allocation16 + $0x80] ss:$8 sps:$4 sm:$0xff]   ;;  %v1786_v23 = vld [vmem:[#allocation16 + $0x90] ss:$8 sps:$4 sm:$0xff]  }
 0x1a8   :  { %v322_v26 = vadd.f32 %v321_v25, %v202_v22  ;;  %v323_v27 = vpop.f32.mrb[2].mxu0  ;;  %v1788_v22 = vld [vmem:[#allocation16 + $0x94] ss:$8 sps:$4 sm:$0xff]   ;;  %v1789_v25 = vld [vmem:[#allocation16 + $0xa0] ss:$8 sps:$4 sm:$0xff]  }
 0x1a9   :  { %v326_v28 = vmax.f32 %v320_v24, 0.0  ;;  %v324_v29 = vpop.f32.mrb[3].mxu0  ;;  %v1791_v24 = vld [vmem:[#allocation16 + $0xa4] ss:$8 sps:$4 sm:$0xff]   ;;  %v1792_v27 = vld [vmem:[#allocation16 + $0xb0] ss:$8 sps:$4 sm:$0xff]  }
 0x1aa   :  { %v327_v30 = vmax.f32 %v322_v26, 0.0  ;;  %v1794_v26 = vld [vmem:[#allocation16 + $0xb4] ss:$8 sps:$4 sm:$0xff]   ;;  %v1795_v29 = vld [vmem:[#allocation16 + $0xc0] ss:$8 sps:$4 sm:$0xff]  }
 0x1ab   :  { %v328_v32 = vpack.c.bf16 %v326_v28, %v326_v28  ;;  %v1797_v28 = vld [vmem:[#allocation16 + $0xc4] ss:$8 sps:$4 sm:$0xff]  }
 0x1ac   :  { %v329_v31 = vpack.c.bf16 %v327_v30, %v327_v30  ;;  %v1800_v30 = vld [vmem:[#allocation16 + $0xd4] ss:$8 sps:$4 sm:$0xff]  }
 0x1ae   :  { %566 = vmatprep.mubr.bf16.mxu1 %v329_v31  ;;  %v1798_v31 = vld [vmem:[#allocation16 + $0xd0] ss:$8 sps:$4 sm:$0xff]  }
 0x1af   :  { %567 = vmatmul.mubr.bf16.vlgmr.msra.gmra.mrb[0].mxu1 %v328_v32  ;;  %v611_v32 = vld [vmem:[#allocation11] sm:$0x3] }
 0x1b0   :  { %970 = vmatprep.mubr.bf16.mxu1 %v2093_v0  ;;  %939 = vmatpush1.bf16.msra.mxu1 %v1735_v37  ;;  %v371_v0 = vrot.slane %v362_v41, %v2311_v20  ;;  %v616_v33 = vrot.slane %v611_v32, %v2309_v18  ;;  %v620_v34 = vrot.slane %v611_v32, %v2311_v20 }
 0x1b1   :  { %940 = vmatprep.subr.bf16.mxu1 %v1740_v39 }
 0x1b4   :  { %941 = vmatpush1.bf16.msra.mxu1 %v1738_v40 }
 0x1b5   :  { %942 = vmatprep.subr.bf16.mxu1 %v1743_v53  ;;  %v1809_v53 = vld [vmem:[%s2407_s11 + $0x48] sm:$0xff]  }
 0x1b8   :  { %943 = vmatpush1.bf16.msra.mxu1 %v1741_v54  ;;  %v1810_v54 = vld [vmem:[%s2407_s11 + $0x8] sm:$0xff]  }
 0x1b9   :  { %944 = vmatprep.subr.bf16.mxu1 %v1746_v55  ;;  %v1811_v55 = vld [vmem:[%s2407_s11 + $0x50] sm:$0xff]  }
 0x1bc   :  { %945 = vmatpush1.bf16.msra.mxu1 %v1744_v56  ;;  %v1812_v56 = vld [vmem:[%s2407_s11 + $0x10] sm:$0xff]  }
 0x1bd   :  { %946 = vmatprep.subr.bf16.mxu1 %v1749_v57  ;;  %v1813_v57 = vld [vmem:[%s2407_s11 + $0x58] sm:$0xff]  }
 0x1c0   :  { %947 = vmatpush1.bf16.msra.mxu1 %v1747_v58  ;;  %v1814_v58 = vld [vmem:[%s2407_s11 + $0x18] sm:$0xff]  }
 0x1c1   :  { %948 = vmatprep.subr.bf16.mxu1 %v1752_v59  ;;  %v1815_v59 = vld [vmem:[%s2407_s11 + $0x60] sm:$0xff]  }
 0x1c4   :  { %949 = vmatpush1.bf16.msra.mxu1 %v1750_v60  ;;  %v1816_v60 = vld [vmem:[%s2407_s11 + $0x20] sm:$0xff]  }
 0x1c5   :  { %950 = vmatprep.subr.bf16.mxu1 %v1755_v61  ;;  %v1817_v61 = vld [vmem:[%s2407_s11 + $0x68] sm:$0xff]  }
 0x1c8   :  { %951 = vmatpush1.bf16.msra.mxu1 %v1753_v62  ;;  %v1818_v62 = vld [vmem:[%s2407_s11 + $0x28] sm:$0xff]  }
 0x1c9   :  { %952 = vmatprep.subr.bf16.mxu1 %v1758_v63  ;;  %v846_v63 = vld [vmem:[#allocation14] sm:$0x3] }
 0x1cc   :  { %953 = vmatpush1.bf16.msra.mxu1 %v1756_v1  ;;  %v851_v1 = vrot.slane %v846_v63, %v2309_v18 }
 0x282   :  { %v568_v43 = vpop.f32.mrb[0].mxu1 }
 0x283   :  { %v569_v44 = vadd.f32 %v568_v43, %v367_v42  ;;  %v570_v45 = vpop.f32.mrb[1].mxu1 }
 0x284   :  { %v571_v46 = vadd.f32 %v570_v45, %v371_v0  ;;  %v572_v47 = vpop.f32.mrb[2].mxu1  ;;  %v175_v0 = vld [vmem:[%s2396_s0 + $0x8] sm:$0xff] }
 0x285   :  { %v575_v48 = vmax.f32 %v569_v44, 0.0  ;;  %v573_v49 = vpop.f32.mrb[3].mxu1  ;;  %v1803_v47 = vld [vmem:[#allocation16 + $0xe4] ss:$8 sps:$4 sm:$0xff]  }
 0x286   :  { %v576_v50 = vmax.f32 %v571_v46, 0.0  ;;  %v1806_v49 = vld [vmem:[#allocation16 + $0xf4] ss:$8 sps:$4 sm:$0xff]  }
 0x287   :  { %v577_v52 = vpack.c.bf16 %v575_v48, %v575_v48  ;;  %v1801_v48 = vld [vmem:[#allocation16 + $0xe0] ss:$8 sps:$4 sm:$0xff]  }
 0x288   :  { %v578_v51 = vpack.c.bf16 %v576_v50, %v576_v50  ;;  %v1804_v50 = vld [vmem:[#allocation16 + $0xf0] ss:$8 sps:$4 sm:$0xff]  }
 0x28a   :  { %815 = vmatprep.mubr.bf16.mxu0 %v578_v51  ;;  %v1807_v51 = vld [vmem:[%s2407_s11 + $0x40] sm:$0xff]  }
 0x28b   :  { %816 = vmatmul.mubr.bf16.vlgmr.msra.gmra.mrb[4].mxu0 %v577_v52  ;;  %v1808_v52 = vld [vmem:[%s2407_s11] sm:$0xff]   ;;  %1579 = vmatprep.subr.bf16.mxu1 %v1807_v51 }
 0x28c   :  { %1188 = vmatpush1.bf16.msra.mxu0 %v1759_v2  ;;  %v855_v2 = vrot.slane %v846_v63, %v2311_v20 }
 0x28d   :  { %1189 = vmatprep.subr.bf16.mxu0 %v1764_v4 }
 0x290   :  { %1190 = vmatpush1.bf16.msra.mxu0 %v1762_v5 }
 0x291   :  { %1191 = vmatprep.subr.bf16.mxu0 %v1767_v6 }
 0x294   :  { %1192 = vmatpush1.bf16.msra.mxu0 %v1765_v7 }
 0x295   :  { %1193 = vmatprep.subr.bf16.mxu0 %v1770_v8 }
 0x298   :  { %1194 = vmatpush1.bf16.msra.mxu0 %v1768_v9 }
 0x299   :  { %1195 = vmatprep.subr.bf16.mxu0 %v1773_v10 }
 0x29c   :  { %1196 = vmatpush1.bf16.msra.mxu0 %v1771_v11 }
 0x29d   :  { %1197 = vmatprep.subr.bf16.mxu0 %v1776_v12 }
 0x2a0   :  { %1198 = vmatpush1.bf16.msra.mxu0 %v1774_v13  ;;  %v1819_v13 = vld [vmem:[%s2407_s11 + $0x70] sm:$0xff]  }
 0x2a1   :  { %1199 = vmatprep.subr.bf16.mxu0 %v1779_v14  ;;  %v1820_v14 = vld [vmem:[%s2407_s11 + $0x30] sm:$0xff]  }
 0x2a4   :  { %1200 = vmatpush1.bf16.msra.mxu0 %v1777_v15  ;;  %v1821_v15 = vld [vmem:[%s2407_s11 + $0x78] sm:$0xff]  }
 0x2a5   :  { %1201 = vmatprep.subr.bf16.mxu0 %v1782_v16  ;;  %v1822_v16 = vld [vmem:[%s2407_s11 + $0x38] sm:$0xff]  }
 0x2a8   :  { %1202 = vmatpush1.bf16.msra.mxu0 %v1780_v17  ;;  %v1015_v17 = vld [vmem:[#allocation17] sm:$0x3] }
 0x2a9   :  { %1203 = vmatprep.subr.bf16.mxu0 %v1785_v19  ;;  %v1020_v19 = vrot.slane %v1015_v17, %v2309_v18 }
 0x2ac   :  { %1204 = vmatpush1.bf16.msra.mxu0 %v1783_v21  ;;  %v1024_v21 = vrot.slane %v1015_v17, %v2311_v20 }
 0x2ad   :  { %1205 = vmatprep.subr.bf16.mxu0 %v1788_v22 }
 0x2b0   :  { %1206 = vmatpush1.bf16.msra.mxu0 %v1786_v23 }
 0x2b1   :  { %1207 = vmatprep.subr.bf16.mxu0 %v1791_v24 }
 0x2b4   :  { %1208 = vmatpush1.bf16.msra.mxu0 %v1789_v25 }
 0x2b5   :  { %1209 = vmatprep.subr.bf16.mxu0 %v1794_v26 }
 0x2b8   :  { %1210 = vmatpush1.bf16.msra.mxu0 %v1792_v27 }
 0x2b9   :  { %1211 = vmatprep.subr.bf16.mxu0 %v1797_v28 }
 0x2bc   :  { %1212 = vmatpush1.bf16.msra.mxu0 %v1795_v29 }
 0x2bd   :  { %1213 = vmatprep.subr.bf16.mxu0 %v1800_v30 }
 0x2c0   :  { %1214 = vmatpush1.bf16.msra.mxu0 %v1798_v31 }
 0x2c1   :  { %1215 = vmatprep.subr.bf16.mxu0 %v1803_v47 }
 0x2c4   :  { %1216 = vmatpush1.bf16.msra.mxu0 %v1801_v48 }
 0x2c5   :  { %1217 = vmatprep.subr.bf16.mxu0 %v1806_v49 }
 0x2c8   :  { %1218 = vmatpush1.bf16.msra.mxu0 %v1804_v50 }
 0x35e   :  { %v817_v35 = vpop.f32.mrb[4].mxu0 }
 0x35f   :  { %v818_v36 = vadd.f32 %v817_v35, %v616_v33  ;;  %v819_v37 = vpop.f32.mrb[5].mxu0  ;;  %v1562_v33 = vld [vmem:[%s2408_s12] ss:$0 sm:$0xff] }
 0x360   :  { %v820_v38 = vadd.f32 %v819_v37, %v620_v34  ;;  %v821_v39 = vpop.f32.mrb[6].mxu0 }
 0x361   :  { %1408 = vst [vmem:[%s2410_s14] sm:$0xff] %v818_v36  ;;  %v822_v40 = vpop.f32.mrb[7].mxu0 }
 0x362   :  { %v824_v41 = vmul.f32 0.5, %v820_v38  ;;  %1409 = vst [vmem:[%s2410_s14 + $0x8] sm:$0xff] %v820_v38 }
 0x364   :  { %v825_v42 = vmul.f32 1.442695, %v824_v41 }
 0x366   :  { %1823 = vpow2.f32 %v825_v42 }
 0x370   :  { %v1824_v43 = vpop.eup %1823 }
 0x371   :  { %v827_v44 = vmul.f32 %v1824_v43, %v175_v0 }
 0x373   :  { %v828_v45 = vadd.f32 %v827_v44, %v818_v36 }
 0x375   :  { %v829_v46 = vpack.c.bf16 %v828_v45, %v828_v45 }
 0x377   :  { %971 = vmatmul.mubr.bf16.vlgmr.msra.gmra.mrb[4].mxu1 %v829_v46 }
 0x378   :  { %1580 = vmatpush3.bf16.msra.mxu1 %v1808_v52 }
 0x379   :  { %1581 = vmatprep.subr.bf16.mxu1 %v1809_v53 }
 0x37c   :  { %1582 = vmatpush3.bf16.msra.mxu1 %v1810_v54 }
 0x37d   :  { %1583 = vmatprep.subr.bf16.mxu1 %v1811_v55 }
 0x380   :  { %1584 = vmatpush3.bf16.msra.mxu1 %v1812_v56 }
 0x381   :  { %1585 = vmatprep.subr.bf16.mxu1 %v1813_v57 }
 0x384   :  { %1586 = vmatpush3.bf16.msra.mxu1 %v1814_v58 }
 0x385   :  { %1587 = vmatprep.subr.bf16.mxu1 %v1815_v59 }
 0x388   :  { %1588 = vmatpush3.bf16.msra.mxu1 %v1816_v60 }
 0x389   :  { %1589 = vmatprep.subr.bf16.mxu1 %v1817_v61 }
 0x38c   :  { %1590 = vmatpush3.bf16.msra.mxu1 %v1818_v62 }
 0x38d   :  { %1591 = vmatprep.subr.bf16.mxu1 %v1819_v13 }
 0x390   :  { %1592 = vmatpush3.bf16.msra.mxu1 %v1820_v14 }
 0x391   :  { %1593 = vmatprep.subr.bf16.mxu1 %v1821_v15 }
 0x394   :  { %1594 = vmatpush3.bf16.msra.mxu1 %v1822_v16 }
 0x44a   :  { %v972_v3 = vpop.f32.mrb[4].mxu1 }
 0x44b   :  { %v973_v4 = vadd.f32 %v972_v3, %v851_v1  ;;  %v974_v5 = vpop.f32.mrb[5].mxu1 }
 0x44c   :  { %v975_v6 = vadd.f32 %v974_v5, %v855_v2  ;;  %v976_v7 = vpop.f32.mrb[6].mxu1 }
 0x44d   :  { %v979_v8 = vmax.f32 %v973_v4, 0.0  ;;  %v977_v9 = vpop.f32.mrb[7].mxu1 }
 0x44e   :  { %v980_v10 = vmax.f32 %v975_v6, 0.0 }
 0x44f   :  { %v981_v12 = vpack.c.bf16 %v979_v8, %v979_v8 }
 0x450   :  { %v982_v11 = vpack.c.bf16 %v980_v10, %v980_v10 }
 0x452   :  { %1219 = vmatprep.mubr.bf16.mxu0 %v982_v11 }
 0x453   :  { %1220 = vmatmul.mubr.bf16.vlgmr.msra.gmra.mrb[8].mxu0 %v981_v12 }
 0x526   :  { %v1221_v22 = vpop.f32.mrb[8].mxu0 }
 0x527   :  { %v1222_v23 = vadd.f32 %v1221_v22, %v1020_v19  ;;  %v1223_v24 = vpop.f32.mrb[9].mxu0 }
 0x528   :  { %v1224_v25 = vadd.f32 %v1223_v24, %v1024_v21  ;;  %v1225_v26 = vpop.f32.mrb[10].mxu0 }
 0x529   :  { %v1228_v27 = vmax.f32 %v1222_v23, 0.0  ;;  %v1226_v28 = vpop.f32.mrb[11].mxu0 }
 0x52a   :  { %v1229_v29 = vmax.f32 %v1224_v25, 0.0 }
 0x52b   :  { %v1230_v31 = vpack.c.bf16 %v1228_v27, %v1228_v27 }
 0x52c   :  { %v1231_v30 = vpack.c.bf16 %v1229_v29, %v1229_v29 }
 0x52e   :  { %1399 = vmatprep.mubr.bf16.mxu1 %v1231_v30 }
 0x52f   :  { %1400 = vmatmul.mubr.bf16.vlgmr.msra.gmra.mrb[8].mxu1 %v1230_v31 }
 0x602   :  { %v1595_v32 = vpop.f32.mrb[8].mxu1 }
 0x603   :  { %v1596_v18 = vpop.f32.mrb[9].mxu1 }
 0x604   :  { %v1597_v20 = vadd.f32 %v1596_v18, %v1595_v32  ;;  %v1598_v34 = vpop.f32.mrb[10].mxu1 }
 0x605   :  { %v1599_v35 = vpop.f32.mrb[11].mxu1 }
 0x606   :  { %v1402_v36 = vadd.f32 %v1597_v20, %v1562_v33 }
 0x608   :  { %1407 = vst [vmem:[#allocation19] sm:$0xff] %v1402_v36 }
 0x609   :  { %2056 = shalt.err (!%p2053_p0)
}
 0x60a   :  { %s2057_s12 = scalar_lea.hbm %s2409_s13, 128 }
 0x60b   :  { %p2058_p1 = scmp.ne.s32.totalorder %s2409_s13, %s2057_s12  ;;  %p2061_p2 = scmp.lt.u32.totalorder %s2057_s12, %s2409_s13 }
 0x60d   :  { %p2063_p3 = pnand %p2061_p2, %p2058_p1 }
 0x60f   :  { %2066 = shalt.err (!%p2063_p3)
}
 0x610   :  { %1419 = dma.vmem_to_hbm [thread:$0]  %s1417_s7, 128, %s2409_s13, [#allocation4]  }
 0x611   :  { %2079 = dma.done.wait [#allocation4], 128  }
 0x612   :  { %2080 = vsyncadd [#allocation4], 4294967168 }
 0x613   :  { %1427 = vsyncpa [#allocation3], 1 }
 0x614   :  { %1428 = vsyncpa [#allocation6], 1 }
 0x615   :  { %1429 = vsyncpa [#allocation9], 1 }
 0x616   :  { %1430 = vsyncpa [#allocation12], 1 }
 0x617   :  { %1431 = vsyncpa [#allocation15], 1 }
 0x618   :  { %1432 = vsyncpa [#allocation18], 1 }
 0x619   :  { %1433 = vsyncpa [#allocation4], 1 }

</bundles_post_ra>
